<compile_context>
chip_gen: v6e
topology: v6e:2x2x1
jax: 0.10.0
libtpu: 0.0.40
codegen_flags: <defaults>
</compile_context>

<pallas_src>
import functools

import numpy as np
import jax
import jax.numpy as jnp
from jax import lax
from jax.experimental import pallas as pl
from jax.experimental.pallas import tpu as pltpu


def _pair_con_loss_kernel(lhs_ref, rhsT_ref, ng_ref, *rest,
                          batch, n_valid, n_padded):
    """One (tm, tn) tile of exp(sim/T); accumulate per-row negative sum Ng.

    lhs_ref : (tm, Dp)   rows of feat, pre-scaled by 1/T   (mm_dtype)
    rhsT_ref: (Dp, tn)   pre-transposed columns of feat    (mm_dtype)
    ng_ref  : (tm, 1)    per-row sum of masked exp-sims    (f32 output)
    rest    : [optional (tm, tn) masked exp-sim tile output,] then the
              (tm, lane_w) f32 lane-group accumulator scratch (always last).
    """
    acc_ref = rest[-1]
    neg_out = rest[:-1]

    i = pl.program_id(0)          # row tile    ("parallel")
    j = pl.program_id(1)          # column tile ("arbitrary", reduction axis)
    nj = pl.num_programs(1)
    tm = lhs_ref.shape[0]
    tn = rhsT_ref.shape[1]
    lane_w = acc_ref.shape[1]

    @pl.when(j == 0)
    def _():
        acc_ref[...] = jnp.zeros_like(acc_ref)

    # sim / T: the LHS already carries the 1/T scale (applied once in the
    # wrapper).  RHS is pre-transposed -> plain A @ B, no per-tile transpose.
    sim = jnp.dot(lhs_ref[...], rhsT_ref[...],
                  preferred_element_type=jnp.float32)          # (tm, tn) f32
    e = jnp.exp(sim)   # assumes L2-normalized inputs (same contract as torch)

    # (row % B) != (col % B) mask from two small iotas; also drop padded cols.
    row_mod = (i * tm + lax.broadcasted_iota(jnp.int32, (tm, 1), 0)) % batch
    col_idx = j * tn + lax.broadcasted_iota(jnp.int32, (1, tn), 1)
    neg_mask = row_mod != (col_idx % batch)
    if n_padded != n_valid:       # static: only when 2B was padded up to 128k
        neg_mask = neg_mask & (col_idx < n_valid)
    e_masked = jnp.where(neg_mask, e, 0.0)

    # Deferred lane reduction: fold the tn lanes into a lane_w-wide accumulator
    # with plain VPU vreg adds; the single cross-lane (XLU) reduce happens only
    # once per row tile, at the last column step.
    for g in range(tn // lane_w):
        acc_ref[...] += e_masked[:, g * lane_w:(g + 1) * lane_w]

    if neg_out:                   # compatibility path only (return_neg=True)
        neg_out[0][...] = e_masked

    @pl.when(j == nj - 1)
    def _():
        ng_ref[...] = jnp.sum(acc_ref[...], axis=-1, keepdims=True)


def _choose_tile(n, target):
    """Largest multiple of 128 <= target dividing n (n itself when n <= target)."""
    if n <= target:
        return n
    t = (target // 128) * 128
    while t >= 128:
        if n % t == 0:
            return t
        t -= 128
    return n


def _vmem_bytes(tm, tn, Dp, mm_bytes, with_neg):
    """Rough per-step VMEM footprint (double-buffered pipelined blocks)."""
    b = 2 * tm * Dp * mm_bytes        # LHS row tile
    b += 2 * Dp * tn * mm_bytes       # RHS column tile (re-streamed)
    b += 2 * tm * 4                   # ng output block
    b += tm * 128 * 4                 # lane-group accumulator scratch
    if with_neg:
        b += 2 * tm * tn * 4          # optional masked exp-sim tile output
    return b


@functools.lru_cache(maxsize=None)
def _neg_gather_idx(n2, batch):
    """Column indices replicating torch masked_select(mask).view(2B, -1)."""
    cols = np.arange(n2)
    keep = (cols[None, :] % batch) != (cols[:, None] % batch)
    idx = np.nonzero(keep)[1].reshape(n2, n2 - 2).astype(np.int32)
    return jnp.asarray(idx)


def pair_con_loss(features_1, features_2, temperature=0.05, *,
                  mm_dtype=jnp.float32, return_neg=False,
                  tm_target=512, tn_target=256, vmem_limit_bytes=None):
    """JAX/Pallas equivalent of PairConLoss.forward."""
    B, D = features_1.shape
    n2 = 2 * B
    inv_temp = 1.0 / float(temperature)

    feat = jnp.concatenate([features_1, features_2], axis=0)        # [2B, D]

    # Pad the contraction dim to a lane multiple (zeros don't change any dot).
    Dp = max(128, ((D + 127) // 128) * 128)
    # Pad 2B up to a multiple of 128 when it is large enough to tile; padded
    # columns are masked out of Ng in-kernel, padded rows sliced off below.
    n2p = n2 if n2 < 128 else ((n2 + 127) // 128) * 128

    feat_p = jnp.zeros((n2p, Dp), jnp.float32).at[:n2, :D].set(
        feat.astype(jnp.float32))

    # LHS pre-scaled by 1/T + cast once; RHS pre-transposed + cast once.
    lhs = (feat_p * inv_temp).astype(mm_dtype)                       # [2Bp, Dp]
    rhsT = feat_p.T.astype(mm_dtype)                                 # [Dp, 2Bp]

    # ---- tile selection -----------------------------------------------------
    if n2p >= 256:                       # keep >= 2 row tiles for megacore
        tm_target = min(tm_target, n2p // 2)
    tm = _choose_tile(n2p, tm_target)
    tn = _choose_tile(n2p, tn_target)

    budget = int(0.75 * vmem_limit_bytes) if vmem_limit_bytes else 12 * 1024 * 1024
    mm_bytes = jnp.dtype(mm_dtype).itemsize
    while (_vmem_bytes(tm, tn, Dp, mm_bytes, return_neg) > budget
           and (tm > 128 or tn > 128)):
        if tm >= tn and tm > 128:
            tm = _choose_tile(n2p, tm // 2)
        elif tn > 128:
            tn = _choose_tile(n2p, tn // 2)
        else:
            tm = _choose_tile(n2p, tm // 2)

    grid = (n2p // tm, n2p // tn)
    lane_w = 128 if tn % 128 == 0 else tn

    kernel = functools.partial(_pair_con_loss_kernel,
                               batch=B, n_valid=n2, n_padded=n2p)

    out_shapes = [jax.ShapeDtypeStruct((n2p, 1), jnp.float32)]
    out_specs = [pl.BlockSpec((tm, 1), lambda i, j: (i, 0))]
    if return_neg:
        out_shapes.append(jax.ShapeDtypeStruct((n2p, n2p), jnp.float32))
        out_specs.append(pl.BlockSpec((tm, tn), lambda i, j: (i, j)))

    cp_kwargs = dict(dimension_semantics=("parallel", "arbitrary"))
    if vmem_limit_bytes is not None:
        cp_kwargs["vmem_limit_bytes"] = int(vmem_limit_bytes)

    outs = pl.pallas_call(
        kernel,
        out_shape=tuple(out_shapes),
        grid=grid,
        in_specs=[
            pl.BlockSpec((tm, Dp), lambda i, j: (i, 0)),   # 1/T-scaled rows
            pl.BlockSpec((Dp, tn), lambda i, j: (0, j)),   # pre-transposed cols
        ],
        out_specs=tuple(out_specs),
        scratch_shapes=[pltpu.VMEM((tm, lane_w), jnp.float32)],
        compiler_params=pltpu.CompilerParams(**cp_kwargs),
    )(lhs, rhsT)

    ng = outs[0][:n2, 0]                                             # [2B]

    # Positive term in f32 (O(B*D) XLA), kept out of the kernel entirely.
    pos_logit = jnp.sum(features_1.astype(jnp.float32) *
                        features_2.astype(jnp.float32), axis=-1) * inv_temp
    pos_logit = jnp.concatenate([pos_logit, pos_logit], axis=0)      # [2B]
    pos = jnp.exp(pos_logit)

    # -log(pos / (Ng + pos)) == log(Ng + pos) - pos_logit
    row_loss = jnp.log(ng + pos) - pos_logit
    loss = jnp.mean(row_loss)
    pos_mean = jnp.mean(pos)
    neg_mean = jnp.sum(ng) / (n2 * (n2 - 2))   # mean of the masked neg matrix

    result = {"loss": loss, "pos_mean": pos_mean, "neg_mean": neg_mean,
              "pos": pos, "Ng": ng, "neg": None}

    if return_neg:
        # torch.masked_select(mask).view(2B, -1): row i keeps cols j with
        # (j % B) != (i % B), row-major.  Gather indices are cached per (2B, B).
        # TODO(synk): per-row-varying lane compaction has no clean in-kernel
        # Pallas equivalent; this compatibility path gathers outside the kernel.
        neg_full = outs[1][:n2, :n2]
        result["neg"] = jnp.take_along_axis(neg_full, _neg_gather_idx(n2, B),
                                            axis=1)
    return result


def _numpy_reference(f1, f2, temperature=0.05):
    f1 = np.asarray(f1, dtype=np.float64)
    f2 = np.asarray(f2, dtype=np.float64)
    B = f1.shape[0]
    feats = np.concatenate([f1, f2], axis=0)
    pos = np.exp(np.sum(f1 * f2, axis=-1) / temperature)
    pos = np.concatenate([pos, pos], axis=0)
    neg_full = np.exp(feats @ feats.T / temperature)
    mask = ~np.tile(np.eye(B, dtype=bool), (2, 2))
    neg = neg_full[mask].reshape(2 * B, -1)
    Ng = neg.sum(axis=-1)
    loss = np.mean(-np.log(pos / (Ng + pos)))
    return {"loss": loss, "pos_mean": pos.mean(), "neg_mean": neg.mean(),
            "pos": pos, "neg": neg, "Ng": Ng}


if __name__ == "__main__":
    temp = 0.05
    master = jax.random.PRNGKey(0)
    k_a, k_b, k_c = jax.random.split(master, 3)

    def make(key, B, D):
        k1, k2 = jax.random.split(key)
        f1 = jax.random.normal(k1, (B, D), dtype=jnp.float32)
        f2 = jax.random.normal(k2, (B, D), dtype=jnp.float32)
        # SCCL feeds L2-normalized embeddings; keeps exp(sim / 0.05) in range.
        f1 = f1 / jnp.linalg.norm(f1, axis=-1, keepdims=True)
        f2 = f2 / jnp.linalg.norm(f2, axis=-1, keepdims=True)
        return f1, f2

    # --- Case 1: tiny shapes, single full-extent tile (grid 1x1). ------------
    f1, f2 = make(k_a, 8, 32)
    ref = _numpy_reference(f1, f2, temp)
    out = pair_con_loss(f1, f2, temp)
    jax.block_until_ready(out["loss"])
    np.testing.assert_allclose(np.asarray(out["loss"]), ref["loss"], rtol=2e-2)
    np.testing.assert_allclose(np.asarray(out["pos_mean"]), ref["pos_mean"], rtol=2e-2)
    np.testing.assert_allclose(np.asarray(out["neg_mean"]), ref["neg_mean"], rtol=2e-2)
    np.testing.assert_allclose(np.asarray(out["pos"]), ref["pos"], rtol=2e-2)
    np.testing.assert_allclose(np.asarray(out["Ng"]), ref["Ng"], rtol=2e-2)

    # --- Case 2: multi-tile grid (2B=256, tm=tn=128 -> 2x2 grid); exercises
    #     cross-column Ng accumulation and the deferred lane reduction. -------
    f1b, f2b = make(k_b, 128, 64)
    refb = _numpy_reference(f1b, f2b, temp)
    outb = pair_con_loss(f1b, f2b, temp, tm_target=128, tn_target=128)
    jax.block_until_ready(outb["loss"])
    np.testing.assert_allclose(np.asarray(outb["loss"]), refb["loss"], rtol=2e-2)
    np.testing.assert_allclose(np.asarray(outb["Ng"]), refb["Ng"], rtol=2e-2)
    np.testing.assert_allclose(np.asarray(outb["neg_mean"]), refb["neg_mean"], rtol=2e-2)

    # --- Case 3: non-128-multiple 2B (2B=144 -> padded to 256); padded cols
    #     masked out of Ng in-kernel, padded rows sliced off in the wrapper. --
    f1c, f2c = make(k_c, 72, 32)
    refc = _numpy_reference(f1c, f2c, temp)
    outc = pair_con_loss(f1c, f2c, temp, tm_target=128, tn_target=128)
    jax.block_until_ready(outc["loss"])
    np.testing.assert_allclose(np.asarray(outc["loss"]), refc["loss"], rtol=2e-2)
    np.testing.assert_allclose(np.asarray(outc["Ng"]), refc["Ng"], rtol=2e-2)

    # --- Case 4: torch masked_select-compatible `neg` matrix. ----------------
    out_neg = pair_con_loss(f1, f2, temp, return_neg=True)
    jax.block_until_ready(out_neg["neg"])
    np.testing.assert_allclose(np.asarray(out_neg["neg"]), ref["neg"], rtol=2e-2)

    # --- Case 5: bf16 MXU streaming knob (throughput vs accuracy; looser tol
    #     because bf16 operand error is amplified by exp(sim/0.05)). ----------
    out_bf16 = pair_con_loss(f1b, f2b, temp, mm_dtype=jnp.bfloat16,
                             tm_target=128, tn_target=128)
    jax.block_until_ready(out_bf16["loss"])
    np.testing.assert_allclose(np.asarray(out_bf16["loss"]), refb["loss"], rtol=1e-1)

    print("KERNEL_OK")
</pallas_src>

<mosaic_0001>
module attributes {stable_mosaic.version = 11 : i64} {
  func.func @_pair_con_loss_kernel(%arg0: i32, %arg1: i32, %arg2: memref<16x128xf32, #tpu.memory_space<vmem>>, %arg3: memref<128x16xf32, #tpu.memory_space<vmem>>, %arg4: memref<16x1xf32, #tpu.memory_space<vmem>>, %arg5: memref<16x16xf32, #tpu.memory_space<vmem>>) attributes {dimension_semantics = [#tpu.dimension_semantics<parallel>, #tpu.dimension_semantics<arbitrary>], iteration_bounds = array<i64: 1, 1>, scalar_prefetch = 0 : i64, scratch_operands = 1 : i64, tpu.core_type = #tpu.core_type<tc>, window_params = [{transform_indices = @transform_0, window_bounds = array<i64: 16, 128>}, {transform_indices = @transform_1, window_bounds = array<i64: 128, 16>}, {transform_indices = @transform_2, window_bounds = array<i64: 16, 1>}]} {
    %c0_i32 = arith.constant 0 : i32
    %0 = arith.cmpi eq, %arg1, %c0_i32 : i32
    %1 = arith.extui %0 : i1 to i32
    %c0_i32_0 = arith.constant 0 : i32
    %2 = arith.cmpi ne, %1, %c0_i32_0 : i32
    scf.if %2 {
      %cst_22 = arith.constant 0.000000e+00 : f32
      %58 = vector.broadcast %cst_22 : f32 to vector<16x16xf32>
      %c0_23 = arith.constant 0 : index
      %c0_24 = arith.constant 0 : index
      %59 = vector.load %arg5[%c0_23, %c0_24] : memref<16x16xf32, #tpu.memory_space<vmem>>, vector<16x16xf32>
      tpu.vector_store %arg5[%c0_23, %c0_24], %58 {strides = array<i32>} : memref<16x16xf32, #tpu.memory_space<vmem>>, vector<16x16xf32>,
    } else {
    }
    %c0 = arith.constant 0 : index
    %c0_1 = arith.constant 0 : index
    %3 = vector.load %arg2[%c0, %c0_1] : memref<16x128xf32, #tpu.memory_space<vmem>>, vector<16x128xf32>
    %c0_2 = arith.constant 0 : index
    %c0_3 = arith.constant 0 : index
    %4 = vector.load %arg3[%c0_2, %c0_3] : memref<128x16xf32, #tpu.memory_space<vmem>>, vector<128x16xf32>
    %cst = arith.constant dense<0.000000e+00> : vector<16x16xf32>
    %5 = tpu.matmul %3, %4, %cst {dimension_numbers = #tpu.dot_dimension_numbers<[1], [0], [0], [1], [0, 0, 1, 1], [], []>} : vector<16x128xf32>, vector<128x16xf32>, vector<16x16xf32> -> vector<16x16xf32>
    %6 = math.exp %5 : vector<16x16xf32>
    %c16_i32 = arith.constant 16 : i32
    %7 = arith.muli %arg0, %c16_i32 : i32
    %8 = tpu.iota {dimensions = array<i32: 0>} : vector<16x1xi32>
    %9 = vector.broadcast %7 : i32 to vector<16x1xi32>
    %10 = arith.addi %9, %8 : vector<16x1xi32>
    %c8_i32 = arith.constant 8 : i32
    %c0_i32_4 = arith.constant 0 : i32
    %11 = arith.cmpi eq, %c8_i32, %c0_i32_4 : i32
    %c1_i32 = arith.constant 1 : i32
    %12 = arith.select %11, %c1_i32, %c8_i32 : i32
    %13 = vector.broadcast %12 : i32 to vector<16x1xi32>
    %14 = arith.remsi %10, %13 : vector<16x1xi32>
    %c0_i32_5 = arith.constant 0 : i32
    %15 = vector.broadcast %c0_i32_5 : i32 to vector<16x1xi32>
    %16 = arith.cmpi ne, %14, %15 : vector<16x1xi32>
    %c0_i32_6 = arith.constant 0 : i32
    %17 = vector.broadcast %c0_i32_6 : i32 to vector<16x1xi32>
    %18 = arith.cmpi slt, %14, %17 : vector<16x1xi32>
    %c0_i32_7 = arith.constant 0 : i32
    %19 = arith.cmpi slt, %12, %c0_i32_7 : i32
    %20 = vector.broadcast %19 : i1 to vector<16x1xi1>
    %21 = vector.broadcast %20 : vector<16x1xi1> to vector<16x1xi1>
    %22 = arith.xori %18, %21 : vector<16x1xi1>
    %23 = arith.andi %22, %16 : vector<16x1xi1>
    %24 = vector.broadcast %12 : i32 to vector<16x1xi32>
    %25 = arith.addi %14, %24 : vector<16x1xi32>
    %26 = arith.select %23, %25, %14 : vector<16x1xi1>, vector<16x1xi32>
    %c16_i32_8 = arith.constant 16 : i32
    %27 = arith.muli %arg1, %c16_i32_8 : i32
    %28 = tpu.iota {dimensions = array<i32: 1>} : vector<1x16xi32>
    %29 = vector.broadcast %27 : i32 to vector<1x16xi32>
    %30 = arith.addi %29, %28 : vector<1x16xi32>
    %c8_i32_9 = arith.constant 8 : i32
    %c0_i32_10 = arith.constant 0 : i32
    %31 = arith.cmpi eq, %c8_i32_9, %c0_i32_10 : i32
    %c1_i32_11 = arith.constant 1 : i32
    %32 = arith.select %31, %c1_i32_11, %c8_i32_9 : i32
    %33 = vector.broadcast %32 : i32 to vector<1x16xi32>
    %34 = arith.remsi %30, %33 : vector<1x16xi32>
    %c0_i32_12 = arith.constant 0 : i32
    %35 = vector.broadcast %c0_i32_12 : i32 to vector<1x16xi32>
    %36 = arith.cmpi ne, %34, %35 : vector<1x16xi32>
    %c0_i32_13 = arith.constant 0 : i32
    %37 = vector.broadcast %c0_i32_13 : i32 to vector<1x16xi32>
    %38 = arith.cmpi slt, %34, %37 : vector<1x16xi32>
    %c0_i32_14 = arith.constant 0 : i32
    %39 = arith.cmpi slt, %32, %c0_i32_14 : i32
    %40 = vector.broadcast %39 : i1 to vector<1x16xi1>
    %41 = vector.broadcast %40 : vector<1x16xi1> to vector<1x16xi1>
    %42 = arith.xori %38, %41 : vector<1x16xi1>
    %43 = arith.andi %42, %36 : vector<1x16xi1>
    %44 = vector.broadcast %32 : i32 to vector<1x16xi32>
    %45 = arith.addi %34, %44 : vector<1x16xi32>
    %46 = arith.select %43, %45, %34 : vector<1x16xi1>, vector<1x16xi32>
    %47 = vector.broadcast %26 : vector<16x1xi32> to vector<16x16xi32>
    %48 = vector.broadcast %46 : vector<1x16xi32> to vector<16x16xi32>
    %49 = arith.cmpi ne, %47, %48 : vector<16x16xi32>
    %cst_15 = arith.constant 0.000000e+00 : f32
    %50 = vector.broadcast %cst_15 : f32 to vector<16x16xf32>
    %51 = arith.select %49, %6, %50 : vector<16x16xi1>, vector<16x16xf32>
    %c0_16 = arith.constant 0 : index
    %c0_17 = arith.constant 0 : index
    %52 = vector.load %arg5[%c0_16, %c0_17] : memref<16x16xf32, #tpu.memory_space<vmem>>, vector<16x16xf32>
    %53 = arith.addf %52, %51 : vector<16x16xf32>
    %c0_18 = arith.constant 0 : index
    %c0_19 = arith.constant 0 : index
    %54 = vector.load %arg5[%c0_18, %c0_19] : memref<16x16xf32, #tpu.memory_space<vmem>>, vector<16x16xf32>
    tpu.vector_store %arg5[%c0_18, %c0_19], %53 {strides = array<i32>} : memref<16x16xf32, #tpu.memory_space<vmem>>, vector<16x16xf32>,
    %c0_i32_20 = arith.constant 0 : i32
    %55 = arith.cmpi eq, %arg1, %c0_i32_20 : i32
    %56 = arith.extui %55 : i1 to i32
    %c0_i32_21 = arith.constant 0 : i32
    %57 = arith.cmpi ne, %56, %c0_i32_21 : i32
    scf.if %57 {
      %c0_22 = arith.constant 0 : index
      %c0_23 = arith.constant 0 : index
      %58 = vector.load %arg5[%c0_22, %c0_23] : memref<16x16xf32, #tpu.memory_space<vmem>>, vector<16x16xf32>
      %cst_24 = arith.constant dense<0.000000e+00> : vector<16xf32>
      %59 = vector.multi_reduction <add>, %58, %cst_24 [1] : vector<16x16xf32> to vector<16xf32>
      %60 = vector.shape_cast %59 : vector<16xf32> to vector<16x1xf32>
      %c0_25 = arith.constant 0 : index
      %c0_26 = arith.constant 0 : index
      %61 = vector.load %arg4[%c0_25, %c0_26] : memref<16x1xf32, #tpu.memory_space<vmem>>, vector<16x1xf32>
      tpu.vector_store %arg4[%c0_25, %c0_26], %60 {strides = array<i32>} : memref<16x1xf32, #tpu.memory_space<vmem>>, vector<16x1xf32>,
    } else {
    }
    return
  }
  func.func @transform_0(%arg0: i32, %arg1: i32) -> (i32, i32) {
    %c0_i32 = arith.constant 0 : i32
    %c0_i32_0 = arith.constant 0 : i32
    return %arg0, %c0_i32 : i32, i32
  }
  func.func @transform_1(%arg0: i32, %arg1: i32) -> (i32, i32) {
    %c0_i32 = arith.constant 0 : i32
    %c0_i32_0 = arith.constant 0 : i32
    return %c0_i32, %arg1 : i32, i32
  }
  func.func @transform_2(%arg0: i32, %arg1: i32) -> (i32, i32) {
    %c0_i32 = arith.constant 0 : i32
    %c0_i32_0 = arith.constant 0 : i32
    return %arg0, %c0_i32 : i32, i32
  }
}

</mosaic_0001>

<bundles_post_ra>
// kernel: tpu_custom_call.1
= control target key start
LH: loop header
LB: loop body
LE: loop exit
PB: predicated region body
PF: predicated region fallthrough
CT: control target
= control target key end

     0   :  { %vm15_vm0 = vcmask 130048   ;;  %v250_v18 = vmov 0.0   ;;  %v116_v19 = vlaneseq  ;;  %vm185_vm3 = vcmask 7168   ;;  %s332_s1 = inlined_call_operand.vmem [shape: f32[128,16], index: 1, kind: input, shape index: {}]   ;;  %s333_s0 = inlined_call_operand.vmem [shape: f32[16,128], index: 0, kind: input, shape index: {}]   ;;  %s334_s2 = inlined_call_operand.vmem [shape: f32[16,1], index: 2, kind: output, shape index: {}]  }
   0x1   :  { %v35_v0 = vld [vmem:[%s332_s1 + $0x78] sm:$0xff]  ;;  %v34_v1 = vld [vmem:[%s332_s1 + $0x70] sm:$0xff]  ;;  %v33_v2 = vld [vmem:[%s332_s1 + $0x68] sm:$0xff]  ;;  %16 = vst.msk [vmem:[#allocation2] sm:$0xff] %vm15_vm0, %v250_v18 }
   0x2   :  { %210 = vmatprep.subr.mxu0 %v35_v0  ;;  %v32_v3 = vld [vmem:[%s332_s1 + $0x60] sm:$0xff]  ;;  %v31_v5 = vld [vmem:[%s332_s1 + $0x58] sm:$0xff]  ;;  %v30_v6 = vld [vmem:[%s332_s1 + $0x50] sm:$0xff]  ;;  %17 = vst.msk [vmem:[#allocation2 + $0x8] sm:$0xff] %vm15_vm0, %v250_v18  ;;  %v117_v22 = vshrl.u32 %v116_v19, 7  ;;  %v148_v26 = vand.u32 127, %v116_v19 }
   0x3   :  { %211 = vmatpush3.msra.mxu0 %v35_v0  ;;  %v18_v4 = vld [vmem:[%s333_s0] sm:$0xff]  ;;  %v29_v7 = vld [vmem:[%s332_s1 + $0x48] sm:$0xff]  ;;  %v27_v9 = vld [vmem:[%s332_s1 + $0x38] sm:$0xff] }
   0x4   :  { %212 = vmatprep.subr.mxu0 %v34_v1  ;;  %242 = vmatprep.mubr.f32.mxu0 %v18_v4  ;;  %v28_v8 = vld [vmem:[%s332_s1 + $0x40] sm:$0xff]  ;;  %v26_v10 = vld [vmem:[%s332_s1 + $0x30] sm:$0xff]  ;;  %v25_v11 = vld [vmem:[%s332_s1 + $0x28] sm:$0xff]  ;;  %v118_v25 = vadd.s32 8, %v117_v22  ;;  %v155_v28 = vand.u32 7, %v148_v26  ;;  %v126_v29 = vand.u32 7, %v117_v22 }
   0x5   :  { %213 = vmatpush3.msra.mxu0 %v34_v1  ;;  %v24_v12 = vld [vmem:[%s332_s1 + $0x20] sm:$0xff]  ;;  %v23_v13 = vld [vmem:[%s332_s1 + $0x18] sm:$0xff]  ;;  %v22_v14 = vld [vmem:[%s332_s1 + $0x10] sm:$0xff] }
   0x6   :  { %214 = vmatprep.subr.mxu0 %v33_v2  ;;  %v21_v15 = vld [vmem:[%s332_s1 + $0x8] sm:$0xff]  ;;  %v20_v16 = vld [vmem:[%s332_s1] sm:$0xff]  ;;  %v133_v27 = vand.u32 7, %v118_v25  ;;  %vm163_vm2 = vcmp.ne.s32.totalorder %v126_v29, %v155_v28 }
   0x7   :  { %215 = vmatpush3.msra.mxu0 %v33_v2  ;;  %v19_v17 = vld [vmem:[%s333_s0 + $0x8] sm:$0xff] }
   0x8   :  { %216 = vmatprep.subr.mxu0 %v32_v3  ;;  %vm164_vm1 = vcmp.ne.s32.totalorder %v133_v27, %v155_v28  ;;  %v167_v33 = vld [vmem:[#allocation2] sm:$0xff] }
   0x9   :  { %217 = vmatpush3.msra.mxu0 %v32_v3  ;;  %v168_v30 = vld [vmem:[#allocation2 + $0x8] sm:$0xff] }
   0xa   :  { %218 = vmatprep.subr.mxu0 %v31_v5 }
   0xb   :  { %219 = vmatpush3.msra.mxu0 %v31_v5 }
   0xc   :  { %220 = vmatprep.subr.mxu0 %v30_v6 }
   0xd   :  { %221 = vmatpush3.msra.mxu0 %v30_v6 }
   0xe   :  { %222 = vmatprep.subr.mxu0 %v29_v7 }
   0xf   :  { %223 = vmatpush3.msra.mxu0 %v29_v7 }
  0x10   :  { %224 = vmatprep.subr.mxu0 %v28_v8 }
  0x11   :  { %225 = vmatpush3.msra.mxu0 %v28_v8 }
  0x12   :  { %226 = vmatprep.subr.mxu0 %v27_v9 }
  0x13   :  { %227 = vmatpush3.msra.mxu0 %v27_v9 }
  0x14   :  { %228 = vmatprep.subr.mxu0 %v26_v10 }
  0x15   :  { %229 = vmatpush3.msra.mxu0 %v26_v10 }
  0x16   :  { %230 = vmatprep.subr.mxu0 %v25_v11 }
  0x17   :  { %231 = vmatpush3.msra.mxu0 %v25_v11 }
  0x18   :  { %232 = vmatprep.subr.mxu0 %v24_v12 }
  0x19   :  { %233 = vmatpush3.msra.mxu0 %v24_v12 }
  0x1a   :  { %234 = vmatprep.subr.mxu0 %v23_v13 }
  0x1b   :  { %235 = vmatpush3.msra.mxu0 %v23_v13 }
  0x1c   :  { %236 = vmatprep.subr.mxu0 %v22_v14 }
  0x1d   :  { %237 = vmatpush3.msra.mxu0 %v22_v14 }
  0x1e   :  { %238 = vmatprep.subr.mxu0 %v21_v15 }
  0x1f   :  { %239 = vmatpush3.msra.mxu0 %v21_v15 }
  0x20   :  { %240 = vmatprep.subr.mxu0 %v20_v16 }
  0x21   :  { %241 = vmatpush3.msra.mxu0 %v20_v16 }
  0x22   :  { %243 = vmatmul.mubr.f32.vlgmr.msra.gmra.mxu0 %v19_v17 }
  0xe2   :  { %v244_v20 = vpop.f32.mrf.mxu0 }
  0xe3   :  { %v113_v21 = vmul.f32 1.442695, %v244_v20 }
  0xe4   :  { %v102_v23 = vpop.f32.mrf.mxu0 }
  0xe5   :  { %246 = vpow2.f32 %v113_v21  ;;  %v111_v24 = vmul.f32 1.442695, %v102_v23 }
  0xe7   :  { %248 = vpow2.f32 %v111_v24 }
  0xf2   :  { %v247_v31 = vpop.eup %246 }
  0xf3   :  { %v166_v32 = vsel %vm164_vm1, %v247_v31, 0.0 }
  0xf4   :  { %v249_v34 = vpop.eup %248  ;;  %v170_v35 = vadd.f32 %v168_v30, %v166_v32 }
  0xf5   :  { %v165_v36 = vsel %vm163_vm2, %v249_v34, 0.0 }
  0xf6   :  { %v169_v37 = vadd.f32 %v167_v33, %v165_v36  ;;  %173 = vst.msk [vmem:[#allocation2 + $0x8] sm:$0xff] %vm15_vm0, %v170_v35 }
  0xf8   :  { %172 = vst.msk [vmem:[#allocation2] sm:$0xff] %vm15_vm0, %v169_v37 }
  0xfd   :  { %v178_v40 = vld [vmem:[#allocation2 + $0x8] sm:$0xff] }
  0xfe   :  { %v182_v41 = vsel %vm15_vm0, %v178_v40, 0.0 }
  0xff   :  { %v177_v38 = vld [vmem:[#allocation2] sm:$0xff] }
 0x100   :  { %v179_v39 = vsel %vm15_vm0, %v177_v38, 0.0 }
 0x101   :  { %180 = vadd.xlane.f32.xlu0 %v179_v39 }
 0x105   :  { %183 = vadd.xlane.f32.xlu0 %v182_v41 }
 0x18a   :  { %v181_v42 = vpop.xlane.xlu0 %180 }
 0x18b   :  { %186 = vst.msk [vmem:[%s334_s2] sm:$0xff] %vm185_vm3, %v181_v42 }
 0x18e   :  { %v184_v43 = vpop.xlane.xlu0 %183 }
 0x18f   :  { %187 = vst.msk [vmem:[%s334_s2 + $0x8] sm:$0xff] %vm185_vm3, %v184_v43 }

</bundles_post_ra>
